<compile_context>
chip_gen: v6e
topology: v6e:2x2x1
jax: 0.10.0
libtpu: 0.0.40
codegen_flags: <defaults>
</compile_context>

<pallas_src>
import functools
import math

import jax
import jax.numpy as jnp
import numpy as np
from jax.experimental import pallas as pl
from jax.experimental.pallas import tpu as pltpu


# ----------------------------------------------------------------------------
# sinusoidal positional encoding (parameter construction, plain JAX)
# ----------------------------------------------------------------------------
def sinusoid_pos_encod(seq_len, dim):
    position = jnp.arange(seq_len, dtype=jnp.float32)[:, None]
    div_term = jnp.exp(
        jnp.arange(0, dim, 2, dtype=jnp.float32) * -(math.log(10000.0) / dim))
    pe = jnp.zeros((seq_len, dim), jnp.float32)
    pe = pe.at[:, 0::2].set(jnp.sin(position * div_term))
    pe = pe.at[:, 1::2].set(jnp.cos(position * div_term))
    return pe


# ----------------------------------------------------------------------------
# fused Pallas kernel: ONE invocation for the whole batch (no grid)
# ----------------------------------------------------------------------------
def _fused_attention_kernel(q_ref, ctx_ref, wq_ref, bq_ref, wkv_ref, add_ref,
                            wo_ref, bo_ref, o_ref, *, num_heads, batch):
    BT, D = q_ref.shape
    T = BT // batch
    hd = D // num_heads
    assert hd == T  # layout trick below requires head_dim == T_q

    # ---- q_proj over all B*T rows (1/scale already folded into wq/bq).
    q = jnp.dot(q_ref[...], wq_ref[...],
                preferred_element_type=jnp.float32) + bq_ref[...]       # (B*T, D)

    # ---- kv_proj: stride-2 Conv1d as a single bf16 matmul (f32 accumulation)
    # over adjacent context-row pairs.  Weight columns were pre-permuted in
    # glue so that, for each per-batch slab,
    #   kv_b[:, h*T:(h+1)*T]        == (K_h + pos_h)^T   shape (head_dim, T)
    #   kv_b[:, D+h*T:D+(h+1)*T]    == (V_h + pos_h)^T   shape (head_dim, T)
    # exactly reproducing PyTorch's conv_out.view(B, T, 2, D) reinterpretation.
    kv_raw = jnp.dot(ctx_ref[...], wkv_ref[...],
                     preferred_element_type=jnp.float32)                # (B*T, 2D)
    add = add_ref[...]                                                  # (hd, 2D)

    batch_rows = []
    for b in range(batch):                        # static unroll, B tiny
        q_b = q[b * T:(b + 1) * T, :]                                   # (T, D)
        kv_b = kv_raw[b * T:(b + 1) * T, :] + add                       # (hd, 2D)
        head_cols = []
        for h in range(num_heads):                # static unroll, H tiny
            q_bh = q_b[:, h * hd:(h + 1) * hd]                          # (T, hd)
            k_t = kv_b[:, h * T:(h + 1) * T]                            # (hd, T) = K_h^T
            v_t = kv_b[:, D + h * T:D + (h + 1) * T]                    # (hd, T) = V_h^T

            # scaled scores (scale already folded into q)
            s = jnp.dot(q_bh, k_t, preferred_element_type=jnp.float32)  # (T, T)
            s = s - jnp.max(s, axis=-1, keepdims=True)
            p = jnp.exp(s)
            p = p / jnp.sum(p, axis=-1, keepdims=True)   # exact divide, (T,1) is free
            # TODO(synk): attn_dropout(p=0.1) omitted — identity in eval mode.

            # P @ V_h without materialising V_h: NT matmul contracting dim 1
            # of V_h^T (no XLU transpose on the dependent chain).
            o_h = jax.lax.dot_general(p, v_t, (((1,), (1,)), ((), ())),
                                      preferred_element_type=jnp.float32)  # (T, hd)
            head_cols.append(o_h)
        batch_rows.append(jnp.concatenate(head_cols, axis=1))           # (T, D)

    heads = jnp.concatenate(batch_rows, axis=0)                         # (B*T, D)
    # Single out_proj matmul for the whole batch (replaces per-head Wo matmuls).
    out = jnp.dot(heads, wo_ref[...],
                  preferred_element_type=jnp.float32) + bo_ref[...]
    o_ref[...] = out.astype(o_ref.dtype)


# ----------------------------------------------------------------------------
# one-time parameter re-layout (glue; constant transforms only)
# ----------------------------------------------------------------------------
def prepare_params(params, num_heads):
    wq = params["wq"]
    D = wq.shape[0]
    conv_w = params["w_kv"]                      # (2D, C, 2) — PyTorch OIH layout
    C = conv_w.shape[1]
    b_kv = params["b_kv"]                        # (2D,)
    pos = params["pos"]                          # (T, D)
    T = pos.shape[0]
    assert D % num_heads == 0
    hd = D // num_heads
    # TODO(synk): the column-permutation layout trick requires head_dim == T_q
    # (holds for this module's usage); other shapes need a transpose fallback.
    assert hd == T, "fused kernel layout requires head_dim == T_q"
    r = 2 * D // T                               # conv channels per kv timestep
    inv_scale = 1.0 / math.sqrt(hd)              # folded into wq/bq (no kernel mul)

    # Dense matmul form of the stride-2 conv: w2[k*C + c, o] = conv_w[o, c, k]
    w2 = jnp.transpose(conv_w, (2, 1, 0)).reshape(2 * C, 2 * D)

    # Column permutation reproducing conv_out(2D, T).view(T, 2, D) per head:
    #   K_h[t, e] = conv_t[e, t*r + h]     V_h[t, e] = conv_t[e, t*r + H + h]
    perm = np.empty((2 * D,), np.int32)
    for h in range(num_heads):
        for t in range(T):
            perm[h * T + t] = t * r + h                    # K_h^T column t
            perm[D + h * T + t] = t * r + num_heads + h    # V_h^T column t
    # bf16 weights: halves the only big weight DMA; dot accumulates in f32.
    w2p = w2[:, perm].astype(jnp.bfloat16)

    # Additive term: conv bias + positional encoding in the same permuted
    # (head_dim, 2D) layout (pos added to both K and V); kept in f32.
    posT = jnp.transpose(pos)                                    # (D, T)
    pos_k = (posT.reshape(num_heads, hd, T)
             .transpose(1, 0, 2).reshape(hd, num_heads * T))     # [e, h*T + t]
    add_kv = jnp.concatenate([pos_k, pos_k], axis=1) + b_kv[perm][None, :]

    return dict(wq=wq * inv_scale,
                bq=(params["bq"] * inv_scale).reshape(1, D),
                w2p=w2p, add_kv=add_kv,
                wo=params["wo"], bo=params["bo"].reshape(1, D))


# ----------------------------------------------------------------------------
# forward pass: one gridless pallas_call (everything resident in VMEM)
# ----------------------------------------------------------------------------
@functools.partial(jax.jit, static_argnames=("num_heads",))
def attention_forward(prep, query, context, *, num_heads):
    B, T, D = query.shape
    Bc, T_kv, C = context.shape
    assert Bc == B and T_kv == 2 * T
    hd = D // num_heads
    assert hd == T

    # Contiguous (free) reshapes: fold batch into rows, pair adjacent ctx rows.
    q2 = query.reshape(B * T, D)
    ctx2 = context.reshape(B * T, 2 * C).astype(jnp.bfloat16)

    kernel = functools.partial(_fused_attention_kernel,
                               num_heads=num_heads, batch=B)

    vmem = pl.BlockSpec(memory_space=pltpu.MemorySpace.VMEM)  # whole-array, no blocking
    out = pl.pallas_call(
        kernel,
        out_shape=jax.ShapeDtypeStruct((B * T, D), query.dtype),
        in_specs=[vmem] * 8,
        out_specs=vmem,
    )(q2, ctx2, prep["wq"], prep["bq"], prep["w2p"], prep["add_kv"],
      prep["wo"], prep["bo"])
    return out.reshape(B, T, D)


# ----------------------------------------------------------------------------
# pure-JAX reference (replicates the PyTorch module in f32, for correctness)
# ----------------------------------------------------------------------------
def reference_forward(params, query, context, num_heads):
    B, T_q, D = query.shape
    H = num_heads
    hd = D // H
    scale = hd ** 0.5
    hp = jax.lax.Precision.HIGHEST

    q = jnp.matmul(query, params["wq"], precision=hp) + params["bq"]
    x = jnp.transpose(context, (0, 2, 1))                      # (B, 384, T_kv)
    conv_out = jax.lax.conv_general_dilated(
        x, params["w_kv"], window_strides=(2,), padding="VALID",
        dimension_numbers=("NCH", "OIH", "NCH"), precision=hp)
    conv_out = conv_out + params["b_kv"][None, :, None]        # (B, 2D, T_q)
    kv = jnp.transpose(conv_out.reshape(B, T_q, 2, D), (0, 2, 1, 3))
    K, V = kv[:, 0] + params["pos"][None], kv[:, 1] + params["pos"][None]

    qh = jnp.transpose(q.reshape(B, T_q, H, hd), (0, 2, 1, 3))
    kh = jnp.transpose(K.reshape(B, T_q, H, hd), (0, 2, 1, 3))
    vh = jnp.transpose(V.reshape(B, T_q, H, hd), (0, 2, 1, 3))

    attn = jax.nn.softmax(
        jnp.einsum("bhqd,bhkd->bhqk", qh, kh, precision=hp) / scale, axis=-1)
    oh = jnp.einsum("bhqk,bhkd->bhqd", attn, vh, precision=hp)
    out = jnp.transpose(oh, (0, 2, 1, 3)).reshape(B, T_q, D)
    return jnp.matmul(out, params["wo"], precision=hp) + params["bo"]


# ----------------------------------------------------------------------------
if __name__ == "__main__":
    B, T_q, D, H = 2, 8, 32, 4      # dim=32, num_heads=4, seq_len=8
    C_in = 384                      # fixed by nn.Conv1d(in_channels=384, ...)
    T_kv = 2 * T_q                  # stride-2 conv must yield T_q steps

    key = jax.random.PRNGKey(0)
    ks = jax.random.split(key, 8)
    params = dict(
        wq=0.05 * jax.random.normal(ks[0], (D, D), jnp.float32),
        bq=0.05 * jax.random.normal(ks[1], (D,), jnp.float32),
        w_kv=0.05 * jax.random.normal(ks[2], (2 * D, C_in, 2), jnp.float32),
        b_kv=0.05 * jax.random.normal(ks[3], (2 * D,), jnp.float32),
        wo=0.05 * jax.random.normal(ks[4], (D, D), jnp.float32),
        bo=0.05 * jax.random.normal(ks[5], (D,), jnp.float32),
        pos=sinusoid_pos_encod(T_q, D),
    )
    query = jax.random.normal(ks[6], (B, T_q, D), jnp.float32)
    context = jax.random.normal(ks[7], (B, T_kv, C_in), jnp.float32)

    prep = prepare_params(params, num_heads=H)
    out = jax.block_until_ready(attention_forward(prep, query, context, num_heads=H))
    ref = jax.block_until_ready(
        reference_forward(params, query, context, num_heads=H))

    # The kv projection (the only K=768 contraction) intentionally runs with
    # bfloat16 operands + f32 accumulation (perf review item 6); expected max
    # abs deviation at the output is ~2-3e-3 (bf16 eps ~ 7.8e-3 over a 768-term
    # reduction, attenuated by the softmax/out_proj).  Everything else in the
    # kernel is exact to ~1e-5.  Tolerance below gives ~3x margin on that bound.
    np.testing.assert_allclose(np.asarray(out), np.asarray(ref),
                               rtol=1e-2, atol=1e-2)

    print("KERNEL_OK")
</pallas_src>

<mosaic_0001>
module attributes {stable_mosaic.version = 11 : i64} {
  func.func @_fused_attention_kernel(%arg0: memref<16x32xf32, #tpu.memory_space<vmem>>, %arg1: memref<16x768xbf16, #tpu.memory_space<vmem>>, %arg2: memref<32x32xf32, #tpu.memory_space<vmem>>, %arg3: memref<1x32xf32, #tpu.memory_space<vmem>>, %arg4: memref<768x64xbf16, #tpu.memory_space<vmem>>, %arg5: memref<8x64xf32, #tpu.memory_space<vmem>>, %arg6: memref<32x32xf32, #tpu.memory_space<vmem>>, %arg7: memref<1x32xf32, #tpu.memory_space<vmem>>, %arg8: memref<16x32xf32, #tpu.memory_space<vmem>>) attributes {dimension_semantics = [], scalar_prefetch = 0 : i64, scratch_operands = 0 : i64, tpu.core_type = #tpu.core_type<tc>} {
    %c0 = arith.constant 0 : index
    %c0_0 = arith.constant 0 : index
    %0 = vector.load %arg0[%c0, %c0_0] : memref<16x32xf32, #tpu.memory_space<vmem>>, vector<16x32xf32>
    %c0_1 = arith.constant 0 : index
    %c0_2 = arith.constant 0 : index
    %1 = vector.load %arg2[%c0_1, %c0_2] : memref<32x32xf32, #tpu.memory_space<vmem>>, vector<32x32xf32>
    %cst = arith.constant dense<0.000000e+00> : vector<16x32xf32>
    %2 = tpu.matmul %0, %1, %cst {dimension_numbers = #tpu.dot_dimension_numbers<[1], [0], [0], [1], [0, 0, 1, 1], [], []>} : vector<16x32xf32>, vector<32x32xf32>, vector<16x32xf32> -> vector<16x32xf32>
    %c0_3 = arith.constant 0 : index
    %c0_4 = arith.constant 0 : index
    %3 = vector.load %arg3[%c0_3, %c0_4] : memref<1x32xf32, #tpu.memory_space<vmem>>, vector<1x32xf32>
    %4 = vector.broadcast %3 : vector<1x32xf32> to vector<16x32xf32>
    %5 = arith.addf %2, %4 : vector<16x32xf32>
    %c0_5 = arith.constant 0 : index
    %c0_6 = arith.constant 0 : index
    %6 = vector.load %arg1[%c0_5, %c0_6] : memref<16x768xbf16, #tpu.memory_space<vmem>>, vector<16x768xbf16>
    %c0_7 = arith.constant 0 : index
    %c0_8 = arith.constant 0 : index
    %7 = vector.load %arg4[%c0_7, %c0_8] : memref<768x64xbf16, #tpu.memory_space<vmem>>, vector<768x64xbf16>
    %cst_9 = arith.constant dense<0.000000e+00> : vector<16x64xf32>
    %8 = tpu.matmul %6, %7, %cst_9 {dimension_numbers = #tpu.dot_dimension_numbers<[1], [0], [0], [1], [0, 0, 1, 1], [], []>} : vector<16x768xbf16>, vector<768x64xbf16>, vector<16x64xf32> -> vector<16x64xf32>
    %c0_10 = arith.constant 0 : index
    %c0_11 = arith.constant 0 : index
    %9 = vector.load %arg5[%c0_10, %c0_11] : memref<8x64xf32, #tpu.memory_space<vmem>>, vector<8x64xf32>
    %10 = vector.extract_strided_slice %5 {offsets = [0, 0], sizes = [8, 32], strides = [1, 1]} : vector<16x32xf32> to vector<8x32xf32>
    %11 = vector.extract_strided_slice %8 {offsets = [0, 0], sizes = [8, 64], strides = [1, 1]} : vector<16x64xf32> to vector<8x64xf32>
    %12 = arith.addf %11, %9 : vector<8x64xf32>
    %13 = vector.extract_strided_slice %10 {offsets = [0, 0], sizes = [8, 8], strides = [1, 1]} : vector<8x32xf32> to vector<8x8xf32>
    %14 = vector.extract_strided_slice %12 {offsets = [0, 0], sizes = [8, 8], strides = [1, 1]} : vector<8x64xf32> to vector<8x8xf32>
    %15 = vector.extract_strided_slice %12 {offsets = [0, 32], sizes = [8, 8], strides = [1, 1]} : vector<8x64xf32> to vector<8x8xf32>
    %cst_12 = arith.constant dense<0.000000e+00> : vector<8x8xf32>
    %16 = tpu.matmul %13, %14, %cst_12 {dimension_numbers = #tpu.dot_dimension_numbers<[1], [0], [0], [1], [0, 0, 1, 1], [], []>} : vector<8x8xf32>, vector<8x8xf32>, vector<8x8xf32> -> vector<8x8xf32>
    %cst_13 = arith.constant dense<0xFF800000> : vector<8xf32>
    %17 = vector.multi_reduction <maximumf>, %16, %cst_13 [1] : vector<8x8xf32> to vector<8xf32>
    %18 = vector.shape_cast %17 : vector<8xf32> to vector<8x1xf32>
    %19 = vector.broadcast %18 : vector<8x1xf32> to vector<8x8xf32>
    %20 = arith.subf %16, %19 : vector<8x8xf32>
    %21 = math.exp %20 : vector<8x8xf32>
    %cst_14 = arith.constant dense<0.000000e+00> : vector<8xf32>
    %22 = vector.multi_reduction <add>, %21, %cst_14 [1] : vector<8x8xf32> to vector<8xf32>
    %23 = vector.shape_cast %22 : vector<8xf32> to vector<8x1xf32>
    %24 = vector.broadcast %23 : vector<8x1xf32> to vector<8x8xf32>
    %25 = arith.divf %21, %24 : vector<8x8xf32>
    %cst_15 = arith.constant dense<0.000000e+00> : vector<8x8xf32>
    %26 = tpu.matmul %25, %15, %cst_15 {dimension_numbers = #tpu.dot_dimension_numbers<[1], [1], [0], [0], [0, 0, 1, 0], [], []>} : vector<8x8xf32>, vector<8x8xf32>, vector<8x8xf32> -> vector<8x8xf32>
    %27 = vector.extract_strided_slice %10 {offsets = [0, 8], sizes = [8, 8], strides = [1, 1]} : vector<8x32xf32> to vector<8x8xf32>
    %28 = vector.extract_strided_slice %12 {offsets = [0, 8], sizes = [8, 8], strides = [1, 1]} : vector<8x64xf32> to vector<8x8xf32>
    %29 = vector.extract_strided_slice %12 {offsets = [0, 40], sizes = [8, 8], strides = [1, 1]} : vector<8x64xf32> to vector<8x8xf32>
    %cst_16 = arith.constant dense<0.000000e+00> : vector<8x8xf32>
    %30 = tpu.matmul %27, %28, %cst_16 {dimension_numbers = #tpu.dot_dimension_numbers<[1], [0], [0], [1], [0, 0, 1, 1], [], []>} : vector<8x8xf32>, vector<8x8xf32>, vector<8x8xf32> -> vector<8x8xf32>
    %cst_17 = arith.constant dense<0xFF800000> : vector<8xf32>
    %31 = vector.multi_reduction <maximumf>, %30, %cst_17 [1] : vector<8x8xf32> to vector<8xf32>
    %32 = vector.shape_cast %31 : vector<8xf32> to vector<8x1xf32>
    %33 = vector.broadcast %32 : vector<8x1xf32> to vector<8x8xf32>
    %34 = arith.subf %30, %33 : vector<8x8xf32>
    %35 = math.exp %34 : vector<8x8xf32>
    %cst_18 = arith.constant dense<0.000000e+00> : vector<8xf32>
    %36 = vector.multi_reduction <add>, %35, %cst_18 [1] : vector<8x8xf32> to vector<8xf32>
    %37 = vector.shape_cast %36 : vector<8xf32> to vector<8x1xf32>
    %38 = vector.broadcast %37 : vector<8x1xf32> to vector<8x8xf32>
    %39 = arith.divf %35, %38 : vector<8x8xf32>
    %cst_19 = arith.constant dense<0.000000e+00> : vector<8x8xf32>
    %40 = tpu.matmul %39, %29, %cst_19 {dimension_numbers = #tpu.dot_dimension_numbers<[1], [1], [0], [0], [0, 0, 1, 0], [], []>} : vector<8x8xf32>, vector<8x8xf32>, vector<8x8xf32> -> vector<8x8xf32>
    %41 = vector.extract_strided_slice %10 {offsets = [0, 16], sizes = [8, 8], strides = [1, 1]} : vector<8x32xf32> to vector<8x8xf32>
    %42 = vector.extract_strided_slice %12 {offsets = [0, 16], sizes = [8, 8], strides = [1, 1]} : vector<8x64xf32> to vector<8x8xf32>
    %43 = vector.extract_strided_slice %12 {offsets = [0, 48], sizes = [8, 8], strides = [1, 1]} : vector<8x64xf32> to vector<8x8xf32>
    %cst_20 = arith.constant dense<0.000000e+00> : vector<8x8xf32>
    %44 = tpu.matmul %41, %42, %cst_20 {dimension_numbers = #tpu.dot_dimension_numbers<[1], [0], [0], [1], [0, 0, 1, 1], [], []>} : vector<8x8xf32>, vector<8x8xf32>, vector<8x8xf32> -> vector<8x8xf32>
    %cst_21 = arith.constant dense<0xFF800000> : vector<8xf32>
    %45 = vector.multi_reduction <maximumf>, %44, %cst_21 [1] : vector<8x8xf32> to vector<8xf32>
    %46 = vector.shape_cast %45 : vector<8xf32> to vector<8x1xf32>
    %47 = vector.broadcast %46 : vector<8x1xf32> to vector<8x8xf32>
    %48 = arith.subf %44, %47 : vector<8x8xf32>
    %49 = math.exp %48 : vector<8x8xf32>
    %cst_22 = arith.constant dense<0.000000e+00> : vector<8xf32>
    %50 = vector.multi_reduction <add>, %49, %cst_22 [1] : vector<8x8xf32> to vector<8xf32>
    %51 = vector.shape_cast %50 : vector<8xf32> to vector<8x1xf32>
    %52 = vector.broadcast %51 : vector<8x1xf32> to vector<8x8xf32>
    %53 = arith.divf %49, %52 : vector<8x8xf32>
    %cst_23 = arith.constant dense<0.000000e+00> : vector<8x8xf32>
    %54 = tpu.matmul %53, %43, %cst_23 {dimension_numbers = #tpu.dot_dimension_numbers<[1], [1], [0], [0], [0, 0, 1, 0], [], []>} : vector<8x8xf32>, vector<8x8xf32>, vector<8x8xf32> -> vector<8x8xf32>
    %55 = vector.extract_strided_slice %10 {offsets = [0, 24], sizes = [8, 8], strides = [1, 1]} : vector<8x32xf32> to vector<8x8xf32>
    %56 = vector.extract_strided_slice %12 {offsets = [0, 24], sizes = [8, 8], strides = [1, 1]} : vector<8x64xf32> to vector<8x8xf32>
    %57 = vector.extract_strided_slice %12 {offsets = [0, 56], sizes = [8, 8], strides = [1, 1]} : vector<8x64xf32> to vector<8x8xf32>
    %cst_24 = arith.constant dense<0.000000e+00> : vector<8x8xf32>
    %58 = tpu.matmul %55, %56, %cst_24 {dimension_numbers = #tpu.dot_dimension_numbers<[1], [0], [0], [1], [0, 0, 1, 1], [], []>} : vector<8x8xf32>, vector<8x8xf32>, vector<8x8xf32> -> vector<8x8xf32>
    %cst_25 = arith.constant dense<0xFF800000> : vector<8xf32>
    %59 = vector.multi_reduction <maximumf>, %58, %cst_25 [1] : vector<8x8xf32> to vector<8xf32>
    %60 = vector.shape_cast %59 : vector<8xf32> to vector<8x1xf32>
    %61 = vector.broadcast %60 : vector<8x1xf32> to vector<8x8xf32>
    %62 = arith.subf %58, %61 : vector<8x8xf32>
    %63 = math.exp %62 : vector<8x8xf32>
    %cst_26 = arith.constant dense<0.000000e+00> : vector<8xf32>
    %64 = vector.multi_reduction <add>, %63, %cst_26 [1] : vector<8x8xf32> to vector<8xf32>
    %65 = vector.shape_cast %64 : vector<8xf32> to vector<8x1xf32>
    %66 = vector.broadcast %65 : vector<8x1xf32> to vector<8x8xf32>
    %67 = arith.divf %63, %66 : vector<8x8xf32>
    %cst_27 = arith.constant dense<0.000000e+00> : vector<8x8xf32>
    %68 = tpu.matmul %67, %57, %cst_27 {dimension_numbers = #tpu.dot_dimension_numbers<[1], [1], [0], [0], [0, 0, 1, 0], [], []>} : vector<8x8xf32>, vector<8x8xf32>, vector<8x8xf32> -> vector<8x8xf32>
    %69 = tpu.concatenate %26, %40, %54, %68 in 1 : vector<8x8xf32>, vector<8x8xf32>, vector<8x8xf32>, vector<8x8xf32> -> vector<8x32xf32>
    %70 = vector.extract_strided_slice %5 {offsets = [8, 0], sizes = [8, 32], strides = [1, 1]} : vector<16x32xf32> to vector<8x32xf32>
    %71 = vector.extract_strided_slice %8 {offsets = [8, 0], sizes = [8, 64], strides = [1, 1]} : vector<16x64xf32> to vector<8x64xf32>
    %72 = arith.addf %71, %9 : vector<8x64xf32>
    %73 = vector.extract_strided_slice %70 {offsets = [0, 0], sizes = [8, 8], strides = [1, 1]} : vector<8x32xf32> to vector<8x8xf32>
    %74 = vector.extract_strided_slice %72 {offsets = [0, 0], sizes = [8, 8], strides = [1, 1]} : vector<8x64xf32> to vector<8x8xf32>
    %75 = vector.extract_strided_slice %72 {offsets = [0, 32], sizes = [8, 8], strides = [1, 1]} : vector<8x64xf32> to vector<8x8xf32>
    %cst_28 = arith.constant dense<0.000000e+00> : vector<8x8xf32>
    %76 = tpu.matmul %73, %74, %cst_28 {dimension_numbers = #tpu.dot_dimension_numbers<[1], [0], [0], [1], [0, 0, 1, 1], [], []>} : vector<8x8xf32>, vector<8x8xf32>, vector<8x8xf32> -> vector<8x8xf32>
    %cst_29 = arith.constant dense<0xFF800000> : vector<8xf32>
    %77 = vector.multi_reduction <maximumf>, %76, %cst_29 [1] : vector<8x8xf32> to vector<8xf32>
    %78 = vector.shape_cast %77 : vector<8xf32> to vector<8x1xf32>
    %79 = vector.broadcast %78 : vector<8x1xf32> to vector<8x8xf32>
    %80 = arith.subf %76, %79 : vector<8x8xf32>
    %81 = math.exp %80 : vector<8x8xf32>
    %cst_30 = arith.constant dense<0.000000e+00> : vector<8xf32>
    %82 = vector.multi_reduction <add>, %81, %cst_30 [1] : vector<8x8xf32> to vector<8xf32>
    %83 = vector.shape_cast %82 : vector<8xf32> to vector<8x1xf32>
    %84 = vector.broadcast %83 : vector<8x1xf32> to vector<8x8xf32>
    %85 = arith.divf %81, %84 : vector<8x8xf32>
    %cst_31 = arith.constant dense<0.000000e+00> : vector<8x8xf32>
    %86 = tpu.matmul %85, %75, %cst_31 {dimension_numbers = #tpu.dot_dimension_numbers<[1], [1], [0], [0], [0, 0, 1, 0], [], []>} : vector<8x8xf32>, vector<8x8xf32>, vector<8x8xf32> -> vector<8x8xf32>
    %87 = vector.extract_strided_slice %70 {offsets = [0, 8], sizes = [8, 8], strides = [1, 1]} : vector<8x32xf32> to vector<8x8xf32>
    %88 = vector.extract_strided_slice %72 {offsets = [0, 8], sizes = [8, 8], strides = [1, 1]} : vector<8x64xf32> to vector<8x8xf32>
    %89 = vector.extract_strided_slice %72 {offsets = [0, 40], sizes = [8, 8], strides = [1, 1]} : vector<8x64xf32> to vector<8x8xf32>
    %cst_32 = arith.constant dense<0.000000e+00> : vector<8x8xf32>
    %90 = tpu.matmul %87, %88, %cst_32 {dimension_numbers = #tpu.dot_dimension_numbers<[1], [0], [0], [1], [0, 0, 1, 1], [], []>} : vector<8x8xf32>, vector<8x8xf32>, vector<8x8xf32> -> vector<8x8xf32>
    %cst_33 = arith.constant dense<0xFF800000> : vector<8xf32>
    %91 = vector.multi_reduction <maximumf>, %90, %cst_33 [1] : vector<8x8xf32> to vector<8xf32>
    %92 = vector.shape_cast %91 : vector<8xf32> to vector<8x1xf32>
    %93 = vector.broadcast %92 : vector<8x1xf32> to vector<8x8xf32>
    %94 = arith.subf %90, %93 : vector<8x8xf32>
    %95 = math.exp %94 : vector<8x8xf32>
    %cst_34 = arith.constant dense<0.000000e+00> : vector<8xf32>
    %96 = vector.multi_reduction <add>, %95, %cst_34 [1] : vector<8x8xf32> to vector<8xf32>
    %97 = vector.shape_cast %96 : vector<8xf32> to vector<8x1xf32>
    %98 = vector.broadcast %97 : vector<8x1xf32> to vector<8x8xf32>
    %99 = arith.divf %95, %98 : vector<8x8xf32>
    %cst_35 = arith.constant dense<0.000000e+00> : vector<8x8xf32>
    %100 = tpu.matmul %99, %89, %cst_35 {dimension_numbers = #tpu.dot_dimension_numbers<[1], [1], [0], [0], [0, 0, 1, 0], [], []>} : vector<8x8xf32>, vector<8x8xf32>, vector<8x8xf32> -> vector<8x8xf32>
    %101 = vector.extract_strided_slice %70 {offsets = [0, 16], sizes = [8, 8], strides = [1, 1]} : vector<8x32xf32> to vector<8x8xf32>
    %102 = vector.extract_strided_slice %72 {offsets = [0, 16], sizes = [8, 8], strides = [1, 1]} : vector<8x64xf32> to vector<8x8xf32>
    %103 = vector.extract_strided_slice %72 {offsets = [0, 48], sizes = [8, 8], strides = [1, 1]} : vector<8x64xf32> to vector<8x8xf32>
    %cst_36 = arith.constant dense<0.000000e+00> : vector<8x8xf32>
    %104 = tpu.matmul %101, %102, %cst_36 {dimension_numbers = #tpu.dot_dimension_numbers<[1], [0], [0], [1], [0, 0, 1, 1], [], []>} : vector<8x8xf32>, vector<8x8xf32>, vector<8x8xf32> -> vector<8x8xf32>
    %cst_37 = arith.constant dense<0xFF800000> : vector<8xf32>
    %105 = vector.multi_reduction <maximumf>, %104, %cst_37 [1] : vector<8x8xf32> to vector<8xf32>
    %106 = vector.shape_cast %105 : vector<8xf32> to vector<8x1xf32>
    %107 = vector.broadcast %106 : vector<8x1xf32> to vector<8x8xf32>
    %108 = arith.subf %104, %107 : vector<8x8xf32>
    %109 = math.exp %108 : vector<8x8xf32>
    %cst_38 = arith.constant dense<0.000000e+00> : vector<8xf32>
    %110 = vector.multi_reduction <add>, %109, %cst_38 [1] : vector<8x8xf32> to vector<8xf32>
    %111 = vector.shape_cast %110 : vector<8xf32> to vector<8x1xf32>
    %112 = vector.broadcast %111 : vector<8x1xf32> to vector<8x8xf32>
    %113 = arith.divf %109, %112 : vector<8x8xf32>
    %cst_39 = arith.constant dense<0.000000e+00> : vector<8x8xf32>
    %114 = tpu.matmul %113, %103, %cst_39 {dimension_numbers = #tpu.dot_dimension_numbers<[1], [1], [0], [0], [0, 0, 1, 0], [], []>} : vector<8x8xf32>, vector<8x8xf32>, vector<8x8xf32> -> vector<8x8xf32>
    %115 = vector.extract_strided_slice %70 {offsets = [0, 24], sizes = [8, 8], strides = [1, 1]} : vector<8x32xf32> to vector<8x8xf32>
    %116 = vector.extract_strided_slice %72 {offsets = [0, 24], sizes = [8, 8], strides = [1, 1]} : vector<8x64xf32> to vector<8x8xf32>
    %117 = vector.extract_strided_slice %72 {offsets = [0, 56], sizes = [8, 8], strides = [1, 1]} : vector<8x64xf32> to vector<8x8xf32>
    %cst_40 = arith.constant dense<0.000000e+00> : vector<8x8xf32>
    %118 = tpu.matmul %115, %116, %cst_40 {dimension_numbers = #tpu.dot_dimension_numbers<[1], [0], [0], [1], [0, 0, 1, 1], [], []>} : vector<8x8xf32>, vector<8x8xf32>, vector<8x8xf32> -> vector<8x8xf32>
    %cst_41 = arith.constant dense<0xFF800000> : vector<8xf32>
    %119 = vector.multi_reduction <maximumf>, %118, %cst_41 [1] : vector<8x8xf32> to vector<8xf32>
    %120 = vector.shape_cast %119 : vector<8xf32> to vector<8x1xf32>
    %121 = vector.broadcast %120 : vector<8x1xf32> to vector<8x8xf32>
    %122 = arith.subf %118, %121 : vector<8x8xf32>
    %123 = math.exp %122 : vector<8x8xf32>
    %cst_42 = arith.constant dense<0.000000e+00> : vector<8xf32>
    %124 = vector.multi_reduction <add>, %123, %cst_42 [1] : vector<8x8xf32> to vector<8xf32>
    %125 = vector.shape_cast %124 : vector<8xf32> to vector<8x1xf32>
    %126 = vector.broadcast %125 : vector<8x1xf32> to vector<8x8xf32>
    %127 = arith.divf %123, %126 : vector<8x8xf32>
    %cst_43 = arith.constant dense<0.000000e+00> : vector<8x8xf32>
    %128 = tpu.matmul %127, %117, %cst_43 {dimension_numbers = #tpu.dot_dimension_numbers<[1], [1], [0], [0], [0, 0, 1, 0], [], []>} : vector<8x8xf32>, vector<8x8xf32>, vector<8x8xf32> -> vector<8x8xf32>
    %129 = tpu.concatenate %86, %100, %114, %128 in 1 : vector<8x8xf32>, vector<8x8xf32>, vector<8x8xf32>, vector<8x8xf32> -> vector<8x32xf32>
    %130 = tpu.concatenate %69, %129 in 0 : vector<8x32xf32>, vector<8x32xf32> -> vector<16x32xf32>
    %c0_44 = arith.constant 0 : index
    %c0_45 = arith.constant 0 : index
    %131 = vector.load %arg6[%c0_44, %c0_45] : memref<32x32xf32, #tpu.memory_space<vmem>>, vector<32x32xf32>
    %cst_46 = arith.constant dense<0.000000e+00> : vector<16x32xf32>
    %132 = tpu.matmul %130, %131, %cst_46 {dimension_numbers = #tpu.dot_dimension_numbers<[1], [0], [0], [1], [0, 0, 1, 1], [], []>} : vector<16x32xf32>, vector<32x32xf32>, vector<16x32xf32> -> vector<16x32xf32>
    %c0_47 = arith.constant 0 : index
    %c0_48 = arith.constant 0 : index
    %133 = vector.load %arg7[%c0_47, %c0_48] : memref<1x32xf32, #tpu.memory_space<vmem>>, vector<1x32xf32>
    %134 = vector.broadcast %133 : vector<1x32xf32> to vector<16x32xf32>
    %135 = arith.addf %132, %134 : vector<16x32xf32>
    %c0_49 = arith.constant 0 : index
    %c0_50 = arith.constant 0 : index
    %136 = vector.load %arg8[%c0_49, %c0_50] : memref<16x32xf32, #tpu.memory_space<vmem>>, vector<16x32xf32>
    tpu.vector_store %arg8[%c0_49, %c0_50], %135 {strides = array<i32>} : memref<16x32xf32, #tpu.memory_space<vmem>>, vector<16x32xf32>,
    return
  }
}

</mosaic_0001>

<bundles_post_ra>
// kernel: attention_forward.1
= control target key start
LH: loop header
LB: loop body
LE: loop exit
PB: predicated region body
PF: predicated region fallthrough
CT: control target
= control target key end

     0   :  { %vm44_vm0 = vcmask 261120   ;;  %s2971_s0 = inlined_call_operand.vmem [shape: f32[16,32], index: 0, kind: input, shape index: {}]   ;;  %s2972_s1 = inlined_call_operand.vmem [shape: bf16[16,768], index: 1, kind: input, shape index: {}]   ;;  %s2973_s2 = inlined_call_operand.vmem [shape: f32[32,32], index: 2, kind: input, shape index: {}]   ;;  %s2974_s3 = inlined_call_operand.vmem [shape: f32[1,32], index: 3, kind: input, shape index: {}]   ;;  %s2975_s4 = inlined_call_operand.vmem [shape: bf16[768,64], index: 4, kind: input, shape index: {}]   ;;  %s2976_s5 = inlined_call_operand.vmem [shape: f32[8,64], index: 5, kind: input, shape index: {}]   ;;  %s2977_s6 = inlined_call_operand.vmem [shape: f32[32,32], index: 6, kind: input, shape index: {}]   ;;  %s2978_s7 = inlined_call_operand.vmem [shape: f32[1,32], index: 7, kind: input, shape index: {}]   ;;  %s2979_s8 = inlined_call_operand.hbm [shape: f32[16,32], index: 8, kind: output, shape index: {}]  }
   0x1   :  { %v36_v0 = vld [vmem:[%s2973_s2 + $0x18] sm:$0xff]  ;;  %v35_v1 = vld [vmem:[%s2973_s2 + $0x10] sm:$0xff]  ;;  %v34_v4 = vld [vmem:[%s2973_s2 + $0x8] sm:$0xff] }
   0x2   :  { %2323 = vmatprep.subr.mxu0 %v36_v0  ;;  %v2439_v2 = vld [vmem:[%s2975_s4 + $0x78] sm:$0xff]   ;;  %v33_v5 = vld [vmem:[%s2973_s2] sm:$0xff]  ;;  %v2441_v6 = vld [vmem:[%s2975_s4 + $0x70] sm:$0xff]  }
   0x3   :  { %2324 = vmatpush3.msra.mxu0 %v36_v0  ;;  %v2440_v3 = vld [vmem:[%s2975_s4 + $0x38] sm:$0xff]   ;;  %2219 = vmatprep.subr.bf16.mxu1 %v2439_v2  ;;  %v2442_v7 = vld [vmem:[%s2975_s4 + $0x30] sm:$0xff]   ;;  %v31_v8 = vld [vmem:[%s2971_s0] sm:$0xff] }
   0x4   :  { %2325 = vmatprep.subr.mxu0 %v35_v1  ;;  %2220 = vmatpush3.bf16.msra.mxu1 %v2440_v3  ;;  %v2443_v9 = vld [vmem:[%s2975_s4 + $0xf8] sm:$0xff]   ;;  %v32_v10 = vld [vmem:[%s2971_s0 + $0x8] sm:$0xff]  ;;  %v2447_v14 = vld [vmem:[%s2975_s4 + $0xf0] sm:$0xff]  }
   0x5   :  { %2326 = vmatpush3.msra.mxu0 %v35_v1  ;;  %2221 = vmatprep.subr.bf16.mxu1 %v2441_v6  ;;  %v2444_v11 = vld [vmem:[%s2975_s4 + $0xb8] sm:$0xff]   ;;  %v2445_v12 = vld [vmem:[%s2975_s4 + $0x68] sm:$0xff]   ;;  %v2448_v15 = vld [vmem:[%s2975_s4 + $0xb0] sm:$0xff]  }
   0x6   :  { %2327 = vmatprep.subr.mxu0 %v34_v4  ;;  %2331 = vmatprep.mubr.msk.f32.mxu0 %vm44_vm0, %v31_v8  ;;  %v2446_v13 = vld [vmem:[%s2975_s4 + $0x28] sm:$0xff]   ;;  %v2449_v16 = vld [vmem:[%s2975_s4 + $0x60] sm:$0xff]   ;;  %v2453_v20 = vld [vmem:[%s2975_s4 + $0x58] sm:$0xff]  }
   0x7   :  { %2328 = vmatpush3.msra.mxu0 %v34_v4  ;;  %v2450_v17 = vld [vmem:[%s2975_s4 + $0x20] sm:$0xff]   ;;  %v2451_v18 = vld [vmem:[%s2975_s4 + $0xe8] sm:$0xff]   ;;  %v2454_v21 = vld [vmem:[%s2975_s4 + $0x18] sm:$0xff]  }
   0x8   :  { %2329 = vmatprep.subr.mxu0 %v33_v5  ;;  %2222 = vmatpush3.bf16.msra.mxu1 %v2442_v7  ;;  %v2452_v19 = vld [vmem:[%s2975_s4 + $0xa8] sm:$0xff]   ;;  %v2455_v22 = vld [vmem:[%s2975_s4 + $0xe0] sm:$0xff]   ;;  %v2457_v24 = vld [vmem:[%s2975_s4 + $0x50] sm:$0xff]  }
   0x9   :  { %2330 = vmatpush3.msra.mxu0 %v33_v5  ;;  %2223 = vmatprep.subr.bf16.mxu1 %v2445_v12  ;;  %v2456_v23 = vld [vmem:[%s2975_s4 + $0xa0] sm:$0xff]   ;;  %v2458_v25 = vld [vmem:[%s2975_s4 + $0x10] sm:$0xff]   ;;  %v2459_v26 = vld [vmem:[%s2975_s4 + $0xd8] sm:$0xff]  }
   0xa   :  { %2241 = vmatprep.subr.bf16.mxu0 %v2443_v9  ;;  %2332 = vmatmul.mubr.msk.f32.vlgmr.msra.gmra.mxu0 %vm44_vm0, %v32_v10  ;;  %v2460_v27 = vld [vmem:[%s2975_s4 + $0x98] sm:$0xff]   ;;  %v2461_v28 = vld [vmem:[%s2975_s4 + $0x48] sm:$0xff]   ;;  %v2463_v30 = vld [vmem:[%s2975_s4 + $0xd0] sm:$0xff]  }
   0xb   :  { %2242 = vmatpush3.bf16.msra.mxu0 %v2444_v11  ;;  %v2462_v29 = vld [vmem:[%s2975_s4 + $0x8] sm:$0xff]   ;;  %v2464_v31 = vld [vmem:[%s2975_s4 + $0x90] sm:$0xff]   ;;  %v2465_v32 = vld [vmem:[%s2975_s4 + $0x40] sm:$0xff]  }
   0xc   :  { %2224 = vmatpush3.bf16.msra.mxu1 %v2446_v13  ;;  %2243 = vmatprep.subr.bf16.mxu0 %v2447_v14  ;;  %v2466_v33 = vld [vmem:[%s2975_s4] sm:$0xff]   ;;  %v2467_v34 = vld [vmem:[%s2975_s4 + $0xc8] sm:$0xff]   ;;  %v2472_v38 = vld [vmem:[%s2975_s4 + $0x178] sm:$0xff]  }
   0xd   :  { %2225 = vmatprep.subr.bf16.mxu1 %v2449_v16  ;;  %v2468_v35 = vld [vmem:[%s2972_s1] ss:$24 sps:$4 sm:$0xff]   ;;  %v2470_v36 = vld [vmem:[%s2972_s1 + $0x4] ss:$24 sps:$4 sm:$0xff]   ;;  %v2471_v37 = vld [vmem:[%s2975_s4 + $0x88] sm:$0xff]  }
   0xe   :  { %578 = vmatprep.mubr.bf16.mxu1 %v2470_v36  ;;  %v2473_v39 = vld [vmem:[%s2975_s4 + $0x138] sm:$0xff]   ;;  %v2474_v40 = vld [vmem:[%s2975_s4 + $0xc0] sm:$0xff]   ;;  %v2476_v42 = vld [vmem:[%s2975_s4 + $0x170] sm:$0xff]  }
   0xf   :  { %2244 = vmatpush3.bf16.msra.mxu0 %v2448_v15  ;;  %v2475_v41 = vld [vmem:[%s2975_s4 + $0x80] sm:$0xff]   ;;  %v2480_v45 = vld [vmem:[%s2975_s4 + $0x130] sm:$0xff]   ;;  %v2481_v46 = vld [vmem:[%s2975_s4 + $0x168] sm:$0xff]  }
  0x10   :  { %2226 = vmatpush3.bf16.msra.mxu1 %v2450_v17  ;;  %2245 = vmatprep.subr.bf16.mxu0 %v2451_v18  ;;  %v2477_v43 = vld [vmem:[%s2972_s1 + $0x8] ss:$24 sps:$4 sm:$0xff]   ;;  %v2479_v44 = vld [vmem:[%s2972_s1 + $0xc] ss:$24 sps:$4 sm:$0xff]   ;;  %v2485_v50 = vld [vmem:[%s2975_s4 + $0x158] sm:$0xff]  }
  0x11   :  { %2227 = vmatprep.subr.bf16.mxu1 %v2453_v20  ;;  %619 = vmatprep.mubr.bf16.mxu0 %v2479_v44  ;;  %v2482_v47 = vld [vmem:[%s2975_s4 + $0x128] sm:$0xff]   ;;  %v2483_v48 = vld [vmem:[%s2975_s4 + $0x160] sm:$0xff]   ;;  %v2486_v51 = vld [vmem:[%s2975_s4 + $0x118] sm:$0xff]  }
  0x12   :  { %v2484_v49 = vld [vmem:[%s2975_s4 + $0x120] sm:$0xff]   ;;  %v2487_v52 = vld [vmem:[%s2975_s4 + $0x150] sm:$0xff]  }
  0x13   :  { %2246 = vmatpush3.bf16.msra.mxu0 %v2452_v19  ;;  %v2495_v53 = vld [vmem:[%s2972_s1 + $0x14] ss:$24 sps:$4 sm:$0xff]  }
  0x14   :  { %2228 = vmatpush3.bf16.msra.mxu1 %v2454_v21  ;;  %2247 = vmatprep.subr.bf16.mxu0 %v2455_v22  ;;  %v2488_v54 = vld [vmem:[%s2975_s4 + $0x110] sm:$0xff]  }
  0x15   :  { %2229 = vmatprep.subr.bf16.mxu1 %v2457_v24 }
  0x17   :  { %2248 = vmatpush3.bf16.msra.mxu0 %v2456_v23 }
  0x18   :  { %2230 = vmatpush3.bf16.msra.mxu1 %v2458_v25  ;;  %2249 = vmatprep.subr.bf16.mxu0 %v2459_v26 }
  0x19   :  { %2231 = vmatprep.subr.bf16.mxu1 %v2461_v28 }
  0x1b   :  { %2250 = vmatpush3.bf16.msra.mxu0 %v2460_v27 }
  0x1c   :  { %2232 = vmatpush3.bf16.msra.mxu1 %v2462_v29  ;;  %2251 = vmatprep.subr.bf16.mxu0 %v2463_v30 }
  0x1d   :  { %2233 = vmatprep.subr.bf16.mxu1 %v2465_v32 }
  0x1f   :  { %2252 = vmatpush3.bf16.msra.mxu0 %v2464_v31 }
  0x20   :  { %2234 = vmatpush3.bf16.msra.mxu1 %v2466_v33  ;;  %2253 = vmatprep.subr.bf16.mxu0 %v2467_v34 }
  0x21   :  { %2263 = vmatprep.subr.bf16.mxu1 %v2472_v38 }
  0x23   :  { %2254 = vmatpush3.bf16.msra.mxu0 %v2471_v37  ;;  %579 = vmatmul.mubr.bf16.vlgmr.msra.gmra.mxu1 %v2468_v35 }
  0x24   :  { %2264 = vmatpush3.bf16.msra.mxu1 %v2473_v39  ;;  %2255 = vmatprep.subr.bf16.mxu0 %v2474_v40 }
  0x25   :  { %2265 = vmatprep.subr.bf16.mxu1 %v2476_v42 }
  0x27   :  { %2256 = vmatpush3.bf16.msra.mxu0 %v2475_v41 }
  0x28   :  { %2266 = vmatpush3.bf16.msra.mxu1 %v2480_v45 }
  0x29   :  { %2267 = vmatprep.subr.bf16.mxu1 %v2481_v46 }
  0x2a   :  { %620 = vmatmul.mubr.bf16.vlgmr.msra.gmra.mxu0 %v2477_v43 }
  0x2c   :  { %2268 = vmatpush3.bf16.msra.mxu1 %v2482_v47 }
  0x2d   :  { %2269 = vmatprep.subr.bf16.mxu1 %v2483_v48 }
  0x30   :  { %2270 = vmatpush3.bf16.msra.mxu1 %v2484_v49 }
  0x31   :  { %2271 = vmatprep.subr.bf16.mxu1 %v2485_v50 }
  0x34   :  { %2272 = vmatpush3.bf16.msra.mxu1 %v2486_v51 }
  0x35   :  { %13 = vsyncpa [#allocation3], 0  ;;  %2273 = vmatprep.subr.bf16.mxu1 %v2487_v52  ;;  %v2489_v55 = vld [vmem:[%s2975_s4 + $0x148] sm:$0xff]   ;;  %660 = vmatprep.mubr.bf16.mxu1 %v2495_v53  ;;  %v2491_v57 = vld [vmem:[%s2975_s4 + $0x140] sm:$0xff]   ;;  %v2550_v60 = vmov 0.0   ;;  %vm2551_vm1 = vmmov 0  }
  0x36   :  { %v2490_v56 = vld [vmem:[%s2975_s4 + $0x108] sm:$0xff]   ;;  %v2492_v58 = vld [vmem:[%s2975_s4 + $0x100] sm:$0xff]   ;;  %2339 = vmatprep.subr.mxu0 %v2550_v60  ;;  %2341 = vmatprep.mubr.msk.f32.mxu0 %vm2551_vm1, %v2550_v60  ;;  %vm671_vm2 = vcmask 64512   ;;  %s2552_s29 = smov 96   ;;  %s2554_s30 = smov 88   ;;  %vm1342_vm3 = vcmask 130048  }
  0x37   :  { %v2493_v59 = vld [vmem:[%s2972_s1 + $0x10] ss:$24 sps:$4 sm:$0xff]   ;;  %v2129_v61 = vld [vmem:[%s2974_s3] ss:$0 sm:$0xff]  ;;  %s2555_s9 = smov 112   ;;  %s2556_s0 = smov 80  }
  0x38   :  { %2274 = vmatpush3.bf16.msra.mxu1 %v2488_v54  ;;  %v669_v18 = vld [vmem:[%s2976_s5] sm:$0xff]  ;;  %s2553_s5 = smov 120   ;;  %s2557_s10 = smov 104   ;;  %vm1344_vm4 = vcmask 195584  }
  0x39   :  { %2275 = vmatprep.subr.bf16.mxu1 %v2489_v55  ;;  %s2558_s11 = smov 72   ;;  %s2559_s12 = smov 8  }
  0x3a   :  { %s2560_s13 = smov 16   ;;  %s2561_s14 = smov 24  }
  0x3b   :  { %s2562_s2 = smov [#allocation2]  }
  0x3c   :  { %2276 = vmatpush3.bf16.msra.mxu1 %v2490_v56  ;;  %s2118_s24 = sshll.u32 %s2562_s2, 4  ;;  %s2119_s24 = int_to_ptr.vmem [resolvable:$true] %s2118_s24 }
  0x3d   :  { %2277 = vmatprep.subr.bf16.mxu1 %v2491_v57  ;;  %s2528_s25 = scalar_lea.vmem %s2119_s24, 256  ;;  %p2533_p1 = scmp.lt.s32.totalorder %s2119_s24, %s2119_s24 }
  0x3e   :  { %p2529_p0 = scmp.ne.s32.totalorder %s2119_s24, %s2528_s25  ;;  %p2534_p2 = scmp.lt.s32.totalorder %s2528_s25, %s2528_s25 }
  0x40   :  { %2278 = vmatpush3.bf16.msra.mxu1 %v2492_v58  ;;  %p2535_p3 = por %p2534_p2, %p2533_p1 }
  0x41   :  { %2334 = vmatprep.subr.mxu1 %v2550_v60 }
  0x42   :  { %p2536_p4 = pnand %p2535_p3, %p2529_p0 }
  0x43   :  { %661 = vmatmul.mubr.bf16.vlgmr.msra.gmra.mxu1 %v2493_v59 }
  0x44   :  { %2336 = vmatprep.mubr.msk.f32.mxu1 %vm2551_vm1, %v2550_v60 }
  0xca   :  { %v2333_v62 = vpop.f32.mrf.mxu0 }
  0xcb   :  { %v2800_v63 = vadd.f32 %v2333_v62, %v2129_v61 }
  0xcc   :  { %v117_v3 = vpop.f32.mrf.mxu0 }
  0xcd   :  { %v2807_v24 = vadd.f32 %v2129_v61, %v117_v3 }
  0xe3   :  { %v2235_v0 = vpop.f32.mrf.mxu1 }
  0xe5   :  { %v2236_v1 = vpop.f32.mrf.mxu1 }
  0xe6   :  { %v2237_v14 = vadd.f32 %v2236_v1, %v2235_v0 }
  0xe7   :  { %v2238_v2 = vpop.f32.mrf.mxu1 }
  0xe9   :  { %v2239_v4 = vpop.f32.mrf.mxu1 }
  0xea   :  { %v2240_v5 = vadd.f32 %v2239_v4, %v2238_v2  ;;  %v2257_v6 = vpop.f32.mrf.mxu0 }
  0xec   :  { %v2258_v7 = vpop.f32.mrf.mxu0 }
  0xed   :  { %v2259_v12 = vadd.f32 %v2258_v7, %v2257_v6 }
  0xee   :  { %v2260_v8 = vpop.f32.mrf.mxu0 }
  0xef   :  { %v622_v16 = vadd.f32 %v2259_v12, %v2237_v14 }
  0xf0   :  { %v2261_v9 = vpop.f32.mrf.mxu0 }
  0xf1   :  { %v2262_v10 = vadd.f32 %v2261_v9, %v2260_v8 }
  0xf3   :  { %v625_v11 = vadd.f32 %v2262_v10, %v2240_v5 }
 0x103   :  { %v2279_v13 = vpop.f32.mrf.mxu1 }
 0x105   :  { %v2280_v15 = vpop.f32.mrf.mxu1 }
 0x106   :  { %v2281_v17 = vadd.f32 %v2280_v15, %v2279_v13 }
 0x107   :  { %v2282_v19 = vpop.f32.mrf.mxu1 }
 0x108   :  { %v663_v20 = vadd.f32 %v2281_v17, %v622_v16 }
 0x109   :  { %v2283_v21 = vpop.f32.mrf.mxu1 }
 0x10a   :  { %v2805_v22 = vadd.f32 %v669_v18, %v663_v20  ;;  %v2284_v23 = vadd.f32 %v2283_v21, %v2282_v19 }
 0x10c   :  { %v666_v25 = vadd.f32 %v2284_v23, %v625_v11  ;;  %757 = vrot.lane.b32.xlu1 %v2805_v22, %s2552_s29  ;;  %2335 = vmatpush3.msra.mxu1 %v2805_v22 }
 0x10d   :  { %2337 = vmatmul.mubr.msk.f32.vlgmr.msra.gmra.mxu1 %vm671_vm2, %v2807_v24  ;;  %2369 = vmatprep.subr.mxu1 %v2550_v60 }
 0x10e   :  { %v2815_v26 = vadd.f32 %v669_v18, %v666_v25  ;;  %2371 = vmatprep.mubr.msk.f32.mxu1 %vm2551_vm1, %v2550_v60 }
 0x110   :  { %836 = vrot.lane.b32.xlu1 %v2805_v22, %s2553_s5 }
 0x17e   :  { %v758_v27 = vpop.permute.xlu1 %757 }
 0x17f   :  { %2340 = vmatpush3.xpose.msk.msra.mxu0 %vm671_vm2, %v758_v27 }
 0x180   :  { %2344 = vmatprep.subr.mxu0 %v2550_v60 }
 0x182   :  { %v837_v39 = vpop.permute.xlu1 %836 }
 0x1cd   :  { %v741_v28 = vpop.f32.mrf.mxu1 }
 0x1ce   :  { %v745_v29 = vsel %vm671_vm2, %v741_v28, -inf }
 0x1cf   :  { %746 = vmax.xlane.f32.xlu0 %v745_v29  ;;  %v2338_v30 = vpop.f32.mrf.mxu1 }
 0x258   :  { %v747_v31 = vpop.xlane.xlu0 %746 }
 0x259   :  { %v748_v32 = vsub.f32 %v741_v28, %v747_v31 }
 0x25b   :  { %v749_v33 = vmul.f32 1.442695, %v748_v32 }
 0x25d   :  { %2496 = vpow2.f32 %v749_v33 }
 0x26a   :  { %v2497_v34 = vpop.eup %2496 }
 0x26b   :  { %v751_v35 = vsel %vm671_vm2, %v2497_v34, 0.0 }
 0x26c   :  { %752 = vadd.xlane.f32.xlu0 %v751_v35 }
 0x282   :  { %834 = vrot.lane.b32.xlu0 %v2807_v24, %s2553_s5 }
 0x2f5   :  { %v753_v36 = vpop.xlane.xlu0 %752 }
 0x2f6   :  { %2498 = vrcp.f32 %v753_v36 }
 0x2f9   :  { %v835_v40 = vpop.permute.xlu0 %834 }
 0x303   :  { %v2499_v37 = vpop.eup %2498 }
 0x304   :  { %v755_v38 = vmul.f32 %v2499_v37, %v2497_v34 }
 0x306   :  { %2342 = vmatmul.mubr.msk.f32.vlgmr.msra.gmra.mxu0 %vm671_vm2, %v755_v38 }
 0x307   :  { %2345 = vmatpush3.msra.mxu0 %v837_v39  ;;  %2346 = vmatprep.mubr.msk.f32.mxu0 %vm2551_vm1, %v2550_v60 }
 0x308   :  { %2349 = vmatprep.subr.mxu0 %v2550_v60 }
 0x30a   :  { %2347 = vmatmul.mubr.msk.f32.vlgmr.msra.gmra.mxu0 %vm671_vm2, %v835_v40 }
 0x30b   :  { %2351 = vmatprep.mubr.msk.f32.mxu0 %vm2551_vm1, %v2550_v60 }
 0x3c6   :  { %v2834_v41 = vpop.f32.mrf.mxu0 }
 0x3c8   :  { %v2343_v42 = vpop.f32.mrf.mxu0 }
 0x3ca   :  { %v907_v43 = vpop.f32.mrf.mxu0 }
 0x3cb   :  { %v911_v44 = vsel %vm671_vm2, %v907_v43, -inf }
 0x3cc   :  { %912 = vmax.xlane.f32.xlu1 %v911_v44  ;;  %v2348_v45 = vpop.f32.mrf.mxu0 }
 0x3dd   :  { %922 = vrot.lane.b32.xlu1 %v2805_v22, %s2554_s30 }
 0x3e1   :  { %999 = vrot.lane.b32.xlu1 %v2807_v24, %s2555_s9 }
 0x455   :  { %v913_v46 = vpop.xlane.xlu1 %912 }
 0x456   :  { %v914_v47 = vsub.f32 %v907_v43, %v913_v46 }
 0x458   :  { %v915_v48 = vmul.f32 1.442695, %v914_v47 }
 0x459   :  { %v923_v49 = vpop.permute.xlu1 %922 }
 0x45a   :  { %2500 = vpow2.f32 %v915_v48  ;;  %2350 = vmatpush3.xpose.msk.msra.mxu0 %vm671_vm2, %v923_v49 }
 0x45b   :  { %2354 = vmatprep.subr.mxu0 %v2550_v60 }
 0x45d   :  { %v1000_v56 = vpop.permute.xlu1 %999 }
 0x467   :  { %v2501_v50 = vpop.eup %2500 }
 0x468   :  { %v917_v51 = vsel %vm671_vm2, %v2501_v50, 0.0 }
 0x469   :  { %918 = vadd.xlane.f32.xlu0 %v917_v51 }
 0x47f   :  { %1001 = vrot.lane.b32.xlu0 %v2805_v22, %s2555_s9 }
 0x4f2   :  { %v919_v52 = vpop.xlane.xlu0 %918 }
 0x4f3   :  { %2502 = vrcp.f32 %v919_v52 }
 0x4f6   :  { %v1002_v55 = vpop.permute.xlu0 %1001 }
 0x500   :  { %v2503_v53 = vpop.eup %2502 }
 0x501   :  { %v921_v54 = vmul.f32 %v2503_v53, %v2501_v50 }
 0x503   :  { %2352 = vmatmul.mubr.msk.f32.vlgmr.msra.gmra.mxu0 %vm671_vm2, %v921_v54 }
 0x504   :  { %2355 = vmatpush3.msra.mxu0 %v1002_v55  ;;  %2356 = vmatprep.mubr.msk.f32.mxu0 %vm2551_vm1, %v2550_v60 }
 0x505   :  { %2359 = vmatprep.subr.mxu0 %v2550_v60 }
 0x507   :  { %2357 = vmatmul.mubr.msk.f32.vlgmr.msra.gmra.mxu0 %vm671_vm2, %v1000_v56 }
 0x508   :  { %2361 = vmatprep.mubr.msk.f32.mxu0 %vm2551_vm1, %v2550_v60 }
 0x5c3   :  { %v2853_v57 = vpop.f32.mrf.mxu0 }
 0x5c5   :  { %v2353_v58 = vpop.f32.mrf.mxu0 }
 0x5c7   :  { %v1072_v59 = vpop.f32.mrf.mxu0 }
 0x5c8   :  { %v1076_v61 = vsel %vm671_vm2, %v1072_v59, -inf }
 0x5c9   :  { %1077 = vmax.xlane.f32.xlu1 %v1076_v61  ;;  %v2358_v62 = vpop.f32.mrf.mxu0 }
 0x5da   :  { %1087 = vrot.lane.b32.xlu1 %v2805_v22, %s2556_s0 }
 0x5de   :  { %1164 = vrot.lane.b32.xlu1 %v2807_v24, %s2557_s10 }
 0x5e2   :  { %1511 = vrot.lane.b32.xlu1 %v2815_v26, %s2553_s5 }
 0x5e6   :  { %1509 = vrot.lane.b32.xlu1 %v2800_v63, %s2553_s5 }
 0x5ea   :  { %1676 = vrot.lane.b32.xlu1 %v2815_v26, %s2555_s9 }
 0x5ee   :  { %1674 = vrot.lane.b32.xlu1 %v2800_v63, %s2555_s9 }
 0x5f2   :  { %1839 = vrot.lane.b32.xlu1 %v2800_v63, %s2557_s10 }
 0x652   :  { %v1078_v0 = vpop.xlane.xlu1 %1077 }
 0x653   :  { %v1079_v1 = vsub.f32 %v1072_v59, %v1078_v0 }
 0x655   :  { %v1080_v2 = vmul.f32 1.442695, %v1079_v1 }
 0x656   :  { %v1088_v3 = vpop.permute.xlu1 %1087 }
 0x657   :  { %2504 = vpow2.f32 %v1080_v2  ;;  %2360 = vmatpush3.xpose.msk.msra.mxu0 %vm671_vm2, %v1088_v3 }
 0x658   :  { %2364 = vmatprep.subr.mxu0 %v2550_v60 }
 0x65a   :  { %v1165_v7 = vpop.permute.xlu1 %1164 }
 0x65e   :  { %v1512_v8 = vpop.permute.xlu1 %1511 }
 0x662   :  { %v1510_v12 = vpop.permute.xlu1 %1509 }
 0x664   :  { %v2505_v4 = vpop.eup %2504 }
 0x665   :  { %v1082_v5 = vsel %vm671_vm2, %v2505_v4, 0.0 }
 0x666   :  { %1083 = vadd.xlane.f32.xlu0 %v1082_v5  ;;  %v1677_v13 = vpop.permute.xlu1 %1676 }
 0x66a   :  { %v1675_v14 = vpop.permute.xlu1 %1674 }
 0x67c   :  { %1166 = vrot.lane.b32.xlu0 %v2805_v22, %s2557_s10 }
 0x680   :  { %1841 = vrot.lane.b32.xlu0 %v2815_v26, %s2557_s10 }
 0x6ef   :  { %v1084_v6 = vpop.xlane.xlu0 %1083 }
 0x6f0   :  { %2506 = vrcp.f32 %v1084_v6 }
 0x6f3   :  { %v1167_v11 = vpop.permute.xlu0 %1166 }
 0x6f7   :  { %v1842_v15 = vpop.permute.xlu0 %1841 }
 0x6fd   :  { %v2507_v9 = vpop.eup %2506 }
 0x6fe   :  { %v1086_v10 = vmul.f32 %v2507_v9, %v2505_v4 }
 0x700   :  { %2362 = vmatmul.mubr.msk.f32.vlgmr.msra.gmra.mxu0 %vm671_vm2, %v1086_v10 }
 0x701   :  { %2365 = vmatpush3.msra.mxu0 %v1167_v11  ;;  %2366 = vmatprep.mubr.msk.f32.mxu0 %vm2551_vm1, %v2550_v60 }
 0x702   :  { %2374 = vmatprep.subr.mxu0 %v2550_v60 }
 0x704   :  { %2367 = vmatmul.mubr.msk.f32.vlgmr.msra.gmra.mxu0 %vm671_vm2, %v1165_v7 }
 0x705   :  { %2375 = vmatpush3.msra.mxu0 %v2815_v26  ;;  %2376 = vmatprep.mubr.msk.f32.mxu0 %vm2551_vm1, %v2550_v60 }
 0x706   :  { %2384 = vmatprep.subr.mxu0 %v2550_v60 }
 0x708   :  { %2377 = vmatmul.mubr.msk.f32.vlgmr.msra.gmra.mxu0 %vm671_vm2, %v2800_v63  ;;  %v1840_v63 = vpop.permute.xlu1 %1839 }
 0x709   :  { %2385 = vmatpush3.msra.mxu0 %v1512_v8  ;;  %2386 = vmatprep.mubr.msk.f32.mxu0 %vm2551_vm1, %v2550_v60 }
 0x70a   :  { %2394 = vmatprep.subr.mxu0 %v2550_v60 }
 0x70c   :  { %2387 = vmatmul.mubr.msk.f32.vlgmr.msra.gmra.mxu0 %vm671_vm2, %v1510_v12 }
 0x70d   :  { %2395 = vmatpush3.msra.mxu0 %v1677_v13  ;;  %2396 = vmatprep.mubr.msk.f32.mxu0 %vm2551_vm1, %v2550_v60 }
 0x70e   :  { %2404 = vmatprep.subr.mxu0 %v2550_v60 }
 0x710   :  { %2397 = vmatmul.mubr.msk.f32.vlgmr.msra.gmra.mxu0 %vm671_vm2, %v1675_v14 }
 0x711   :  { %2405 = vmatpush3.msra.mxu0 %v1842_v15  ;;  %2406 = vmatprep.mubr.msk.f32.mxu0 %vm2551_vm1, %v2550_v60 }
 0x714   :  { %2407 = vmatmul.mubr.msk.f32.vlgmr.msra.gmra.mxu0 %vm671_vm2, %v1840_v63 }
 0x7c0   :  { %v2895_v16 = vpop.f32.mrf.mxu0 }
 0x7c2   :  { %v2363_v17 = vpop.f32.mrf.mxu0 }
 0x7c4   :  { %v1237_v18 = vpop.f32.mrf.mxu0 }
 0x7c5   :  { %v1241_v19 = vsel %vm671_vm2, %v1237_v18, -inf }
 0x7c6   :  { %1242 = vmax.xlane.f32.xlu0 %v1241_v19  ;;  %v2368_v20 = vpop.f32.mrf.mxu0 }
 0x7c7   :  { %v2022_v20 = vld [vmem:[%s2977_s6 + $0x18] sm:$0xff] }
 0x7c8   :  { %v1416_v21 = vpop.f32.mrf.mxu0  ;;  %2414 = vmatprep.subr.mxu0 %v2022_v20 }
 0x7c9   :  { %v1420_v23 = vsel %vm671_vm2, %v1416_v21, -inf  ;;  %2415 = vmatpush3.msra.mxu0 %v2022_v20 }
 0x7ca   :  { %1421 = vmax.xlane.f32.xlu1 %v1420_v23  ;;  %v2378_v24 = vpop.f32.mrf.mxu0  ;;  %v2019_v23 = vld [vmem:[%s2977_s6] sm:$0xff] }
 0x7cc   :  { %v1582_v25 = vpop.f32.mrf.mxu0 }
 0x7cd   :  { %v1586_v27 = vsel %vm671_vm2, %v1582_v25, -inf }
 0x7ce   :  { %1587 = vmax.xlane.f32.xlu0 %v1586_v27  ;;  %v2388_v28 = vpop.f32.mrf.mxu0 }
 0x7d0   :  { %v1747_v29 = vpop.f32.mrf.mxu0 }
 0x7d1   :  { %v1751_v30 = vsel %vm671_vm2, %v1747_v29, -inf }
 0x7d2   :  { %1752 = vmax.xlane.f32.xlu0 %v1751_v30  ;;  %v2398_v31 = vpop.f32.mrf.mxu0 }
 0x7d4   :  { %v1912_v32 = vpop.f32.mrf.mxu0 }
 0x7d5   :  { %v1916_v33 = vsel %vm671_vm2, %v1912_v32, -inf }
 0x7d6   :  { %1917 = vmax.xlane.f32.xlu1 %v1916_v33  ;;  %v2408_v34 = vpop.f32.mrf.mxu0 }
 0x7e7   :  { %1252 = vrot.lane.b32.xlu1 %v2805_v22, %s2558_s11 }
 0x7eb   :  { %1597 = vrot.lane.b32.xlu1 %v2815_v26, %s2554_s30 }
 0x84f   :  { %v1243_v35 = vpop.xlane.xlu0 %1242 }
 0x850   :  { %v1244_v36 = vsub.f32 %v1237_v18, %v1243_v35 }
 0x852   :  { %v1245_v37 = vmul.f32 1.442695, %v1244_v36 }
 0x853   :  { %v1422_v38 = vpop.xlane.xlu1 %1421 }
 0x854   :  { %2508 = vpow2.f32 %v1245_v37  ;;  %v1423_v39 = vsub.f32 %v1416_v21, %v1422_v38  ;;  %v2021_v21 = vld [vmem:[%s2977_s6 + $0x10] sm:$0xff] }
 0x855   :  { %2416 = vmatprep.subr.mxu0 %v2021_v21 }
 0x856   :  { %v1424_v40 = vmul.f32 1.442695, %v1423_v39  ;;  %2417 = vmatpush3.msra.mxu0 %v2021_v21 }
 0x857   :  { %v1588_v42 = vpop.xlane.xlu0 %1587 }
 0x858   :  { %2510 = vpow2.f32 %v1424_v40  ;;  %v1589_v53 = vsub.f32 %v1582_v25, %v1588_v42 }
 0x85a   :  { %v1590_v54 = vmul.f32 1.442695, %v1589_v53 }
 0x85b   :  { %v1753_v43 = vpop.xlane.xlu0 %1752 }
 0x85c   :  { %v1754_v44 = vsub.f32 %v1747_v29, %v1753_v43 }
 0x85e   :  { %v1755_v45 = vmul.f32 1.442695, %v1754_v44  ;;  %v2210_v44 = vld [vmem:[%s2978_s7] ss:$0 sm:$0xff] }
 0x85f   :  { %v1918_v46 = vpop.xlane.xlu1 %1917 }
 0x860   :  { %2512 = vpow2.f32 %v1755_v45  ;;  %v1919_v55 = vsub.f32 %v1912_v32, %v1918_v46 }
 0x861   :  { %v2509_v47 = vpop.eup %2508  ;;  %2514 = vpow2.f32 %v1590_v54 }
 0x862   :  { %v1247_v22 = vsel %vm671_vm2, %v2509_v47, 0.0  ;;  %v1920_v56 = vmul.f32 1.442695, %v1919_v55 }
 0x863   :  { %1248 = vadd.xlane.f32.xlu0 %v1247_v22  ;;  %v1253_v48 = vpop.permute.xlu1 %1252 }
 0x864   :  { %2370 = vmatpush3.xpose.msk.msra.mxu1 %vm671_vm2, %v1253_v48  ;;  %2516 = vpow2.f32 %v1920_v56 }
 0x865   :  { %v2511_v49 = vpop.eup %2510  ;;  %2379 = vmatprep.subr.mxu1 %v2550_v60 }
 0x866   :  { %v1426_v50 = vsel %vm671_vm2, %v2511_v49, 0.0 }
 0x867   :  { %1427 = vadd.xlane.f32.xlu1 %v1426_v50  ;;  %v1598_v0 = vpop.permute.xlu1 %1597 }
 0x86d   :  { %v2513_v51 = vpop.eup %2512 }
 0x86e   :  { %v1757_v52 = vsel %vm671_vm2, %v2513_v51, 0.0  ;;  %v2515_v58 = vpop.eup %2514 }
 0x86f   :  { %1758 = vadd.xlane.f32.xlu1 %v1757_v52  ;;  %v1592_v59 = vsel %vm671_vm2, %v2515_v58, 0.0 }
 0x871   :  { %v2517_v61 = vpop.eup %2516 }
 0x872   :  { %v1922_v62 = vsel %vm671_vm2, %v2517_v61, 0.0 }
 0x879   :  { %1432 = vrot.lane.b32.xlu0 %v2815_v26, %s2552_s29 }
 0x880   :  { %1762 = vrot.lane.b32.xlu1 %v2815_v26, %s2556_s0 }
 0x884   :  { %1330 = vrot.lane.b32.xlu1 %v2853_v57, %s2559_s12 }
 0x898   :  { %1593 = vadd.xlane.f32.xlu0 %v1592_v59 }
 0x89c   :  { %1923 = vadd.xlane.f32.xlu0 %v1922_v62 }
 0x8b2   :  { %1927 = vrot.lane.b32.xlu0 %v2815_v26, %s2558_s11 }
 0x8b6   :  { %1334 = vrot.lane.b32.xlu0 %v2895_v16, %s2560_s13 }
 0x8ec   :  { %v1249_v57 = vpop.xlane.xlu0 %1248 }
 0x8ed   :  { %2518 = vrcp.f32 %v1249_v57 }
 0x8f0   :  { %v1428_v1 = vpop.xlane.xlu1 %1427  ;;  %v1433_v4 = vpop.permute.xlu0 %1432 }
 0x8f1   :  { %2520 = vrcp.f32 %v1428_v1 }
 0x8f8   :  { %v1759_v6 = vpop.xlane.xlu1 %1758 }
 0x8fa   :  { %v2519_v2 = vpop.eup %2518 }
 0x8fb   :  { %v1251_v3 = vmul.f32 %v2519_v2, %v2509_v47 }
 0x8fc   :  { %v1763_v12 = vpop.permute.xlu1 %1762 }
 0x8fd   :  { %2372 = vmatmul.mubr.msk.f32.vlgmr.msra.gmra.mxu1 %vm671_vm2, %v1251_v3 }
 0x8fe   :  { %v2521_v5 = vpop.eup %2520  ;;  %2380 = vmatpush3.xpose.msk.msra.mxu1 %vm671_vm2, %v1433_v4  ;;  %2381 = vmatprep.mubr.msk.f32.mxu1 %vm2551_vm1, %v2550_v60 }
 0x8ff   :  { %2389 = vmatprep.subr.mxu1 %v2550_v60  ;;  %v1430_v26 = vmul.f32 %v2521_v5, %v2511_v49 }
 0x900   :  { %v1331_v31 = vpop.permute.xlu1 %1330 }
 0x901   :  { %2382 = vmatmul.mubr.msk.f32.vlgmr.msra.gmra.mxu1 %vm671_vm2, %v1430_v26  ;;  %v1341_v33 = vsel %vm671_vm2, %v2834_v41, %v1331_v31 }
 0x902   :  { %2390 = vmatpush3.xpose.msk.msra.mxu1 %vm671_vm2, %v1598_v0  ;;  %2391 = vmatprep.mubr.msk.f32.mxu1 %vm2551_vm1, %v2550_v60 }
 0x903   :  { %2399 = vmatprep.subr.mxu1 %v2550_v60 }
 0x921   :  { %v1594_v7 = vpop.xlane.xlu0 %1593 }
 0x922   :  { %2522 = vrcp.f32 %v1594_v7 }
 0x923   :  { %2524 = vrcp.f32 %v1759_v6 }
 0x925   :  { %v1924_v8 = vpop.xlane.xlu0 %1923 }
 0x926   :  { %2526 = vrcp.f32 %v1924_v8 }
 0x929   :  { %v1928_v15 = vpop.permute.xlu0 %1927 }
 0x92d   :  { %v1335_v32 = vpop.permute.xlu0 %1334 }
 0x92e   :  { %v1343_v34 = vsel %vm1342_vm3, %v1341_v33, %v1335_v32 }
 0x92f   :  { %v2523_v9 = vpop.eup %2522 }
 0x930   :  { %v1596_v10 = vmul.f32 %v2523_v9, %v2515_v58  ;;  %v2525_v11 = vpop.eup %2524 }
 0x931   :  { %v1761_v13 = vmul.f32 %v2525_v11, %v2513_v51 }
 0x932   :  { %2392 = vmatmul.mubr.msk.f32.vlgmr.msra.gmra.mxu1 %vm671_vm2, %v1596_v10 }
 0x933   :  { %2400 = vmatpush3.xpose.msk.msra.mxu1 %vm671_vm2, %v1763_v12  ;;  %2401 = vmatprep.mubr.msk.f32.mxu1 %vm2551_vm1, %v2550_v60  ;;  %v2527_v14 = vpop.eup %2526 }
 0x934   :  { %2409 = vmatprep.subr.mxu1 %v2550_v60  ;;  %v1926_v63 = vmul.f32 %v2527_v14, %v2517_v61 }
 0x936   :  { %2402 = vmatmul.mubr.msk.f32.vlgmr.msra.gmra.mxu1 %vm671_vm2, %v1761_v13 }
 0x937   :  { %2410 = vmatpush3.xpose.msk.msra.mxu1 %vm671_vm2, %v1928_v15  ;;  %2411 = vmatprep.mubr.msk.f32.mxu1 %vm2551_vm1, %v2550_v60  ;;  %v2020_v60 = vld [vmem:[%s2977_s6 + $0x8] sm:$0xff] }
 0x938   :  { %2418 = vmatprep.subr.mxu0 %v2020_v60 }
 0x939   :  { %2419 = vmatpush3.msra.mxu0 %v2020_v60 }
 0x93a   :  { %2412 = vmatmul.mubr.msk.f32.vlgmr.msra.gmra.mxu1 %vm671_vm2, %v1926_v63  ;;  %2420 = vmatprep.subr.mxu0 %v2019_v23 }
 0x93b   :  { %2421 = vmatpush3.msra.mxu0 %v2019_v23 }
 0x9bd   :  { %v1325_v16 = vpop.f32.mrf.mxu1 }
 0x9be   :  { %1338 = vrot.lane.b32.xlu0 %v1325_v16, %s2561_s14 }
 0x9bf   :  { %v2373_v17 = vpop.f32.mrf.mxu1 }
 0x9c1   :  { %v1505_v18 = vpop.f32.mrf.mxu1 }
 0x9c3   :  { %v2383_v19 = vpop.f32.mrf.mxu1 }
 0x9f2   :  { %v1670_v24 = vpop.f32.mrf.mxu1 }
 0x9f3   :  { %2005 = vrot.lane.b32.xlu1 %v1670_v24, %s2559_s12 }
 0x9f4   :  { %v2393_v25 = vpop.f32.mrf.mxu1 }
 0x9f6   :  { %v1835_v27 = vpop.f32.mrf.mxu1 }
 0x9f7   :  { %2009 = vrot.lane.b32.xlu1 %v1835_v27, %s2560_s13 }
 0x9f8   :  { %v2403_v28 = vpop.f32.mrf.mxu1 }
 0x9fa   :  { %v2000_v29 = vpop.f32.mrf.mxu1 }
 0x9fb   :  { %2013 = vrot.lane.b32.xlu0 %v2000_v29, %s2561_s14 }
 0x9fc   :  { %v2413_v30 = vpop.f32.mrf.mxu1 }
 0xa30   :  { %v1339_v35 = vpop.permute.xlu0 %1338 }
 0xa31   :  { %v1345_v36 = vsel %vm1344_vm4, %v1343_v34, %v1339_v35 }
 0xa32   :  { %2422 = vmatprep.mubr.msk.f32.mxu0 %vm44_vm0, %v1345_v36 }
 0xa65   :  { %v2006_v37 = vpop.permute.xlu1 %2005 }
 0xa66   :  { %v2016_v39 = vsel %vm671_vm2, %v1505_v18, %v2006_v37 }
 0xa69   :  { %v2010_v38 = vpop.permute.xlu1 %2009 }
 0xa6a   :  { %v2017_v40 = vsel %vm1342_vm3, %v2016_v39, %v2010_v38 }
 0xa6d   :  { %v2014_v42 = vpop.permute.xlu0 %2013 }
 0xa6e   :  { %v2018_v43 = vsel %vm1344_vm4, %v2017_v40, %v2014_v42 }
 0xa6f   :  { %2423 = vmatmul.mubr.msk.f32.vlgmr.msra.gmra.mxu0 %vm44_vm0, %v2018_v43 }
 0xb2f   :  { %v2424_v45 = vpop.f32.mrf.mxu0 }
 0xb30   :  { %v2108_v41 = vadd.f32 %v2424_v45, %v2210_v44 }
 0xb31   :  { %v2102_v46 = vpop.f32.mrf.mxu0 }
 0xb32   :  { %2112 = vst.msk [vmem:[#allocation2 + $0x8] sm:$0xff] %vm44_vm0, %v2108_v41  ;;  %v2103_v47 = vadd.f32 %v2210_v44, %v2102_v46 }
 0xb34   :  { %2111 = vst.msk [vmem:[#allocation2] sm:$0xff] %vm44_vm0, %v2103_v47 }
 0xb35   :  { %2539 = shalt.err (!%p2536_p4)
}
 0xb36   :  { %s2563_s26 = smov 128  }
 0xb37   :  { %2124 = dma.vmem_to_hbm [thread:$0]  %s2119_s24, 256, %s2979_s8, [#allocation3], %s2563_s26, %s2563_s26, %s2559_s12  }
 0xb38   :  { %2548 = dma.done.wait [#allocation3], 256  }
 0xb39   :  { %2549 = vsyncadd [#allocation3], 4294967040 }
 0xb3a   :  { %2128 = vsyncpa [#allocation3], 1 }

</bundles_post_ra>
